<compile_context>
chip_gen: v6e
topology: v6e:2x2x1
jax: 0.10.0
libtpu: 0.0.40
codegen_flags: <defaults>
</compile_context>

<pallas_src>
import functools

import jax
import jax.numpy as jnp
from jax.experimental import pallas as pl
from jax.experimental.pallas import tpu as pltpu


# Keep the per-call working set comfortably under v7x's 64 MiB physical VMEM
# (v5e/v6e have 128 MiB; the 32 MiB scoped default is raised explicitly).
_VMEM_LIMIT_BYTES = 48 * 1024 * 1024
_VMEM_TILE_BUDGET = 36 * 1024 * 1024


def _round_down(x, m):
    return max(m, (x // m) * m)


def _pick_row_tile(M, bytes_per_row, max_tile=1024):
    """Row tile for row-independent kernels (ragged tail is harmless)."""
    cap = max(8, _VMEM_TILE_BUDGET // max(1, bytes_per_row))
    t = min(M, max_tile, cap)
    if t >= M:
        return M
    return _round_down(t, 8)


def _pick_reduce_tile(N, bytes_per_row):
    """Sequence tile for the ctx reduction: must divide N exactly (a ragged
    tail would feed padding into the column max/sum)."""
    cap = max(8, _VMEM_TILE_BUDGET // max(1, bytes_per_row))
    if N <= cap:
        return N
    t = _round_down(min(N, cap), 8)
    while t >= 8:
        if N % t == 0:
            return t
        t -= 8
    # TODO(synk): pad N to a multiple of 8 in the wrapper instead of falling
    # back to the full sequence when N has no usable divisor.
    return N


def _head_groups(C, D, num_heads, max_block_width=256):
    """Split the C channels into head groups no wider than the MXU tile so the
    (gw, gw) context matmuls do not burn masked-away FLOPs.
    max_block_width: 256 for v6e/v7x; pass 128 when targeting v5e."""
    if C <= max_block_width:
        return 1, C
    g = max(1, max_block_width // D)
    while num_heads % g:
        g -= 1
    # NOTE: for G > 1 the in-kernel group slices are lane slices; gw should be
    # a multiple of 128 (true for typical D=64, g>=2) to stay relayout-free.
    return num_heads // g, g * D


# --------------------------------------------------------------------------
# Kernel 1: qkv projection.  grid = (M/tm, role); role j selects q/k/v weight
# slab and output slab.  fp32 x tile is cast to bf16 on the VPU in-kernel.
# --------------------------------------------------------------------------
def _qkv_kernel(x_ref, w_ref, o_ref):
    x = x_ref[...].astype(w_ref.dtype)
    o_ref[...] = jnp.dot(x, w_ref[...],
                         preferred_element_type=jnp.float32).astype(o_ref.dtype)


def qkv_projection(x2d, w_qkv3, *, out_dtype):
    """x2d: (M, Cin); w_qkv3: (3, Cin, C) pre-transposed/cast. Returns (3, M, C)."""
    M, Cin = x2d.shape
    _, _, C = w_qkv3.shape
    x_it = x2d.dtype.itemsize
    w_it = w_qkv3.dtype.itemsize
    tm = _pick_row_tile(M, 2 * (Cin * x_it + C * w_it))
    grid = (pl.cdiv(M, tm), 3)
    ce = pl.CostEstimate(
        flops=2 * M * Cin * 3 * C,
        transcendentals=0,
        bytes_accessed=(M * Cin * x_it + 3 * Cin * C * w_it
                        + 3 * M * C * jnp.dtype(out_dtype).itemsize),
    )
    return pl.pallas_call(
        _qkv_kernel,
        out_shape=jax.ShapeDtypeStruct((3, M, C), out_dtype),
        grid=grid,
        in_specs=[
            pl.BlockSpec((tm, Cin), lambda i, j: (i, 0)),
            pl.BlockSpec((None, Cin, C), lambda i, j: (j, 0, 0)),
        ],
        out_specs=pl.BlockSpec((None, tm, C), lambda i, j: (j, i, 0)),
        compiler_params=pltpu.CompilerParams(
            dimension_semantics=("parallel", "parallel"),
            vmem_limit_bytes=_VMEM_LIMIT_BYTES),
        cost_estimate=ce,
    )(x2d, w_qkv3)


# --------------------------------------------------------------------------
# Kernel 2a: context reduction over sequence tiles (online column softmax).
# ctx is stored transposed: ctxT[e, d] = sum_n v[n, e] * softmax_n(k)[n, d].
# --------------------------------------------------------------------------
def _ctx_reduce_kernel(k_ref, v_ref, mask_ref, ctxT_ref, m_sc, s_sc, acc_sc, *,
                       groups, gw):
    nt = pl.program_id(1)

    @pl.when(nt == 0)
    def _():
        m_sc[...] = jnp.full_like(m_sc, -jnp.inf)
        s_sc[...] = jnp.zeros_like(s_sc)
        acc_sc[...] = jnp.zeros_like(acc_sc)

    k = k_ref[...].astype(jnp.float32)                        # (tn, C)
    v = v_ref[...]                                            # (tn, C) bf16

    m_prev = m_sc[...]                                        # (1, C)
    m_new = jnp.maximum(m_prev, jnp.max(k, axis=0, keepdims=True))
    alpha = jnp.exp(m_prev - m_new)                           # (1, C)
    ke = jnp.exp(k - m_new)                                   # (tn, C) fp32
    s_sc[...] = alpha * s_sc[...] + jnp.sum(ke, axis=0, keepdims=True)
    m_sc[...] = m_new

    ke_c = ke.astype(v.dtype)
    for gi in range(groups):
        sl = slice(gi * gw, (gi + 1) * gw)
        part = jax.lax.dot_general(                           # v^T-style matmul
            v[:, sl], ke_c[:, sl], (((0,), (0,)), ((), ())),
            preferred_element_type=jnp.float32)               # (gw, gw)
        acc_sc[gi] = acc_sc[gi] * alpha[:, sl] + part         # lane broadcast

    @pl.when(nt == pl.num_programs(1) - 1)
    def _():
        # Fold the softmax 1/sum into ctx (C^2 multiplies, lane broadcast)
        # instead of scaling q (N*C multiplies + extra casts).
        inv = pl.reciprocal(s_sc[...], approx=True)           # (1, C) on EUP
        for gi in range(groups):
            sl = slice(gi * gw, (gi + 1) * gw)
            ctxT_ref[gi] = (acc_sc[gi] * inv[:, sl] * mask_ref[...]
                            ).astype(ctxT_ref.dtype)


# --------------------------------------------------------------------------
# Kernel 2b: apply phase with fused output projection:
#   out_tile = (q_tile @ ctx) @ Wp^T + b
# --------------------------------------------------------------------------
def _attn_apply_kernel(q_ref, ctxT_ref, wp_ref, b_ref, o_ref, *, groups, gw):
    q = q_ref[...]                                            # (tq, C) bf16
    out = None
    for gi in range(groups):
        sl = slice(gi * gw, (gi + 1) * gw)
        # att[n, e] = sum_d q[n, d] * ctxT[e, d]
        att = jax.lax.dot_general(
            q[:, sl], ctxT_ref[gi], (((1,), (1,)), ((), ())),
            preferred_element_type=jnp.float32)               # (tq, gw)
        part = jnp.dot(att.astype(wp_ref.dtype), wp_ref[sl, :],
                       preferred_element_type=jnp.float32)    # (tq, C)
        out = part if out is None else out + part
    out = out + b_ref[...]
    o_ref[...] = out.astype(o_ref.dtype)


def efficient_attention_pallas(qkv3, mask, w_projT, b_proj2d, *, groups, gw,
                               out_dtype):
    """qkv3: (3, B, N, C) bf16.  Returns (B, N, C) = proj(attention(q,k,v))."""
    _, B, N, C = qkv3.shape
    cdt = qkv3.dtype
    it = jnp.dtype(cdt).itemsize

    # ---- phase A: per-batch normalized context (stored transposed) ---------
    tn = _pick_reduce_tile(N, 2 * 2 * C * it)      # k & v tiles, double-buffered
    grid_a = (B, N // tn)
    ce_a = pl.CostEstimate(
        flops=2 * B * N * C * gw,
        transcendentals=B * N * C,
        bytes_accessed=2 * B * N * C * it + B * groups * gw * gw * it,
    )
    ctxT = pl.pallas_call(
        functools.partial(_ctx_reduce_kernel, groups=groups, gw=gw),
        out_shape=jax.ShapeDtypeStruct((B, groups, gw, gw), cdt),
        grid=grid_a,
        in_specs=[
            pl.BlockSpec((None, None, tn, C), lambda b, n: (1, b, n, 0)),  # k
            pl.BlockSpec((None, None, tn, C), lambda b, n: (2, b, n, 0)),  # v
            pl.BlockSpec((gw, gw), lambda b, n: (0, 0)),                   # mask
        ],
        out_specs=pl.BlockSpec((None, groups, gw, gw), lambda b, n: (b, 0, 0, 0)),
        scratch_shapes=[
            pltpu.VMEM((1, C), jnp.float32),             # running column max
            pltpu.VMEM((1, C), jnp.float32),             # running column sum
            pltpu.VMEM((groups, gw, gw), jnp.float32),   # ctx^T accumulator
        ],
        compiler_params=pltpu.CompilerParams(
            dimension_semantics=("parallel", "arbitrary"),
            vmem_limit_bytes=_VMEM_LIMIT_BYTES),
        cost_estimate=ce_a,
    )(qkv3, qkv3, mask)

    # ---- phase B: out = (q @ ctx) @ Wp^T + b  (projection fused) -----------
    out_it = jnp.dtype(out_dtype).itemsize
    tq = _pick_row_tile(N, 2 * (C * it + C * out_it))
    grid_b = (B, pl.cdiv(N, tq))
    ce_b = pl.CostEstimate(
        flops=2 * B * N * C * gw + 2 * B * N * C * C,
        transcendentals=0,
        bytes_accessed=(B * N * C * it + B * groups * gw * gw * it
                        + C * C * it + B * N * C * out_it),
    )
    return pl.pallas_call(
        functools.partial(_attn_apply_kernel, groups=groups, gw=gw),
        out_shape=jax.ShapeDtypeStruct((B, N, C), out_dtype),
        grid=grid_b,
        in_specs=[
            pl.BlockSpec((None, None, tq, C), lambda b, i: (0, b, i, 0)),  # q
            pl.BlockSpec((None, groups, gw, gw), lambda b, i: (b, 0, 0, 0)),
            pl.BlockSpec((C, C), lambda b, i: (0, 0)),                     # Wp^T
            pl.BlockSpec((1, C), lambda b, i: (0, 0)),                     # bias
        ],
        out_specs=pl.BlockSpec((None, tq, C), lambda b, i: (b, i, 0)),
        compiler_params=pltpu.CompilerParams(
            dimension_semantics=("parallel", "parallel"),
            vmem_limit_bytes=_VMEM_LIMIT_BYTES),
        cost_estimate=ce_b,
    )(qkv3, ctxT, w_projT, b_proj2d)


# --------------------------------------------------------------------------
# One-time parameter preparation + full forward pass
# --------------------------------------------------------------------------
def prepare_params(params, num_heads, *, compute_dtype=jnp.bfloat16,
                   max_block_width=256):
    """Convert torch-layout fp32 params into kernel-ready form once (transposed
    + cast), so the per-call path emits no relayout/cast XLA ops."""
    C = params["w_proj"].shape[0]
    D = C // num_heads
    groups, gw = _head_groups(C, D, num_heads, max_block_width)
    # qkv weight (3C, Cin) -> (3, Cin, C): per-role transposed bf16 weights.
    w_qkv3 = (params["w_qkv"].reshape(3, C, C).transpose(0, 2, 1)
              .astype(compute_dtype))
    w_projT = params["w_proj"].T.astype(compute_dtype)
    b_proj = params["b_proj"].astype(jnp.float32).reshape(1, C)
    # Block-diagonal same-head mask within one head group, precomputed once and
    # DMA'd as a tiny resident input (no per-step iota/divide/where).
    hid = jnp.arange(gw) // D
    mask = (hid[:, None] == hid[None, :]).astype(jnp.float32)
    return dict(w_qkv3=w_qkv3, w_projT=w_projT, b_proj=b_proj, mask=mask,
                groups=groups, gw=gw)


def efficient_attention_forward(x, prepared, *, out_dtype=jnp.float32):
    """x: (B, N, C).  NOTE: the PyTorch module defines self.scale but never
    applies it in forward(); that behaviour is reproduced here.  Pass
    out_dtype=jnp.bfloat16 to halve the final writeback traffic if the consumer
    tolerates bf16."""
    B, N, C = x.shape
    qkv3 = qkv_projection(x.reshape(B * N, C), prepared["w_qkv3"],
                          out_dtype=prepared["w_qkv3"].dtype)
    qkv3 = qkv3.reshape(3, B, N, C)                 # free reshape, lane-aligned
    return efficient_attention_pallas(
        qkv3, prepared["mask"], prepared["w_projT"], prepared["b_proj"],
        groups=prepared["groups"], gw=prepared["gw"], out_dtype=out_dtype)


# --------------------------------------------------------------------------
# References
# --------------------------------------------------------------------------
def reference_forward(x, params, num_heads):
    """Pure fp32 reference mirroring the PyTorch forward exactly."""
    B, N, C = x.shape
    H = num_heads
    D = C // H
    qkv = x @ params["w_qkv"].T
    qkv = qkv.reshape(B, N, 3, H, D).transpose(2, 0, 3, 1, 4)
    q, k, v = qkv[0], qkv[1], qkv[2]
    k = jax.nn.softmax(k, axis=-2)
    ctx = jnp.einsum("bhnd,bhne->bhde", k, v)
    out = jnp.einsum("bhnd,bhde->bhne", q, ctx)
    out = out.transpose(0, 2, 1, 3).reshape(B, N, C)
    return out @ params["w_proj"].T + params["b_proj"]


def reference_forward_mixed(x, params, num_heads, compute_dtype=jnp.bfloat16):
    """Mirrors the kernel's bf16-input / fp32-accumulate compute path."""
    B, N, C = x.shape
    D = C // num_heads
    cdt = compute_dtype
    qkv = jnp.einsum("bnc,cd->bnd", x.astype(cdt),
                     params["w_qkv"].T.astype(cdt),
                     preferred_element_type=jnp.float32).astype(cdt)
    q = qkv[..., :C]
    k = qkv[..., C:2 * C].astype(jnp.float32)
    v = qkv[..., 2 * C:]
    ke = jnp.exp(k - k.max(axis=1, keepdims=True))                    # (B,N,C)
    s = ke.sum(axis=1, keepdims=True)                                 # (B,1,C)
    ctx = jnp.einsum("bnc,bne->bce", ke.astype(cdt), v,
                     preferred_element_type=jnp.float32)              # (B,C,C)
    hid = jnp.arange(C) // D
    mask = (hid[:, None] == hid[None, :]).astype(jnp.float32)
    ctx = (ctx * (1.0 / s).reshape(B, C, 1) * mask).astype(cdt)
    att = jnp.einsum("bnc,bce->bne", q, ctx,
                     preferred_element_type=jnp.float32).astype(cdt)
    return (jnp.einsum("bnc,cd->bnd", att, params["w_proj"].T.astype(cdt),
                       preferred_element_type=jnp.float32)
            + params["b_proj"])


if __name__ == "__main__":
    # Small, module-consistent shapes: B=2, N=8 tokens, C=32 channels, 8 heads.
    B, N, C, H = 2, 8, 32, 8

    key = jax.random.PRNGKey(0)
    kx, kw1, kw2, kb2 = jax.random.split(key, 4)

    x = jax.random.normal(kx, (B, N, C), dtype=jnp.float32)
    params = {
        # torch nn.Linear weight layout: (out_features, in_features)
        "w_qkv": jax.random.normal(kw1, (3 * C, C), dtype=jnp.float32) * 0.05,
        "w_proj": jax.random.normal(kw2, (C, C), dtype=jnp.float32) * 0.05,
        "b_proj": jax.random.normal(kb2, (C,), dtype=jnp.float32) * 0.05,
    }

    prepared = prepare_params(params, num_heads=H)
    out = efficient_attention_forward(x, prepared)
    out = jax.block_until_ready(out)
    assert out.shape == (B, N, C)

    # Tight-ish check vs. a reference mirroring the bf16/fp32-acc compute path,
    # and a looser sanity check vs. the pure fp32 PyTorch-equivalent reference
    # (bf16 MXU inputs + approx reciprocal cannot match fp32 to 1e-4).
    ref_mixed = reference_forward_mixed(x, params, num_heads=H)
    ref_fp32 = reference_forward(x, params, num_heads=H)
    assert jnp.allclose(out, ref_mixed, atol=1e-2, rtol=1e-2), "mismatch vs mixed ref"
    assert jnp.allclose(out, ref_fp32, atol=2e-2, rtol=2e-2), "mismatch vs fp32 ref"

    print("KERNEL_OK")
</pallas_src>

<mosaic_0001>
module attributes {stable_mosaic.version = 11 : i64} {
  func.func @_qkv_kernel(%arg0: i32, %arg1: i32, %arg2: memref<16x32xf32, #tpu.memory_space<vmem>>, %arg3: memref<1x32x32xbf16, #tpu.memory_space<vmem>>, %arg4: memref<1x16x32xbf16, #tpu.memory_space<vmem>>) attributes {dimension_semantics = [#tpu.dimension_semantics<parallel>, #tpu.dimension_semantics<parallel>], iteration_bounds = array<i64: 1, 3>, scalar_prefetch = 0 : i64, scratch_operands = 0 : i64, tpu.core_type = #tpu.core_type<tc>, window_params = [{transform_indices = @transform_0, window_bounds = array<i64: 16, 32>}, {transform_indices = @transform_1, window_bounds = array<i64: 1, 32, 32>}, {transform_indices = @transform_2, window_bounds = array<i64: 1, 16, 32>}]} {
    %c0 = arith.constant 0 : index
    %c0_0 = arith.constant 0 : index
    %0 = vector.load %arg2[%c0, %c0_0] : memref<16x32xf32, #tpu.memory_space<vmem>>, vector<16x32xf32>
    %1 = arith.truncf %0 : vector<16x32xf32> to vector<16x32xbf16>
    %c0_1 = arith.constant 0 : index
    %c0_2 = arith.constant 0 : index
    %c0_3 = arith.constant 0 : index
    %2 = vector.load %arg3[%c0_1, %c0_2, %c0_3] : memref<1x32x32xbf16, #tpu.memory_space<vmem>>, vector<1x32x32xbf16>
    %3 = vector.shape_cast %2 : vector<1x32x32xbf16> to vector<32x32xbf16>
    %cst = arith.constant dense<0.000000e+00> : vector<16x32xf32>
    %4 = tpu.matmul %1, %3, %cst {dimension_numbers = #tpu.dot_dimension_numbers<[1], [0], [0], [1], [0, 0, 1, 1], [], []>} : vector<16x32xbf16>, vector<32x32xbf16>, vector<16x32xf32> -> vector<16x32xf32>
    %5 = arith.truncf %4 : vector<16x32xf32> to vector<16x32xbf16>
    %c0_4 = arith.constant 0 : index
    %c0_5 = arith.constant 0 : index
    %c0_6 = arith.constant 0 : index
    %6 = vector.load %arg4[%c0_4, %c0_5, %c0_6] : memref<1x16x32xbf16, #tpu.memory_space<vmem>>, vector<1x16x32xbf16>
    %7 = vector.shape_cast %6 : vector<1x16x32xbf16> to vector<16x32xbf16>
    %8 = vector.shape_cast %5 : vector<16x32xbf16> to vector<1x16x32xbf16>
    tpu.vector_store %arg4[%c0_4, %c0_5, %c0_6], %8 {strides = array<i32>} : memref<1x16x32xbf16, #tpu.memory_space<vmem>>, vector<1x16x32xbf16>,
    return
  }
  func.func @transform_0(%arg0: i32, %arg1: i32) -> (i32, i32) {
    %c0_i32 = arith.constant 0 : i32
    %c0_i32_0 = arith.constant 0 : i32
    return %arg0, %c0_i32 : i32, i32
  }
  func.func @transform_1(%arg0: i32, %arg1: i32) -> (i32, i32, i32) {
    %c0_i32 = arith.constant 0 : i32
    %c0_i32_0 = arith.constant 0 : i32
    %c0_i32_1 = arith.constant 0 : i32
    return %arg1, %c0_i32, %c0_i32_0 : i32, i32, i32
  }
  func.func @transform_2(%arg0: i32, %arg1: i32) -> (i32, i32, i32) {
    %c0_i32 = arith.constant 0 : i32
    %c0_i32_0 = arith.constant 0 : i32
    return %arg1, %arg0, %c0_i32 : i32, i32, i32
  }
}

</mosaic_0001>

<bundles_post_ra>
// kernel: tpu_custom_call.1
= control target key start
LH: loop header
LB: loop body
LE: loop exit
PB: predicated region body
PF: predicated region fallthrough
CT: control target
= control target key end

     0   :  { %7 = vsyncpa [#allocation3], 0  ;;  %s857_s0 = inlined_call_operand.hbm [shape: f32[16,32], index: 0, kind: input, shape index: {}]   ;;  %s858_s1 = inlined_call_operand.hbm [shape: bf16[3,32,32], index: 1, kind: input, shape index: {}]   ;;  %s859_s2 = inlined_call_operand.hbm [shape: bf16[3,16,32], index: 2, kind: output, shape index: {}]  }
   0x1   :  { %8 = vsyncpa [#allocation6], 0 }
   0x2   :  { %10 = vsyncpa [#allocation6 + $0x1], 0 }
   0x3   :  { %11 = vsyncpa [#allocation4], 0 }
   0x4   :  { %13 = vsyncpa [#allocation4 + $0x1], 0  ;;  %s677_s9 = smov 0   ;;  %s679_s10 = smov 0  }
   0x5   :  { %s681_s11 = smov 0   ;;  %s683_s12 = smov 0  }
   0x6   :  { %s685_s13 = smov 0   ;;  %s687_s14 = smov 0  }
   0x7 LB: > { %s391_s15 = sadd.s32 4294967295, %s649_s14   ;;  %s392_s16 = sadd.s32 4294967294, %s649_s14   ;;  %s649_s14 = sphi %s687_s14, %s19_s14   ;;  %s645_s13 = sphi %s685_s13, %s876_s13   ;;  %s641_s12 = sphi %s683_s12, %s875_s12   ;;  %s637_s11 = sphi %s681_s11, %s874_s11   ;;  %s633_s10 = sphi %s679_s10, %s873_s10   ;;  %s629_s9 = sphi %s677_s9, %s872_s9  }
   0x8   : > { %p77_p0 = scmp.ne.s32.totalorder %s633_s10, %s629_s9  ;;  %p711_p1 = scmp.eq.s32.totalorder %s391_s15, 0 }
   0x9   : > { %p715_p2 = scmp.eq.s32.totalorder %s391_s15, 2  ;;  %p109_p3 = scmp.eq.s32.totalorder %s392_s16, 2 }
   0xa   : > { %p721_p4 = por %p711_p1, %p77_p0  ;;  %p393_p5 = scmp.ge.s32.totalorder %s649_s14, 1 }
   0xb   : > { %p726_p6 = por %p109_p3, %p77_p0  ;;  %p116_p7 = scmp.lt.s32.totalorder %s649_s14, 4 }
   0xc   : > { %s651_s22 = smov [#allocation2]   ;;  %s28_s25 = sadd.s32 1, %s645_s13 }
   0xd   : > { %s864_s20 = scalar_select %p726_p6, 1, 0 }
   0xe   : > { %p731_p8 = pnand %p393_p5, %p116_p7  ;;  %s131_s23 = sshll.u32 %s651_s22, 4  ;;  %s132_s23 = int_to_ptr.vmem [resolvable:$true] %s131_s23 }
   0xf   : > { %s522_s26 = scalar_lea.vmem %s132_s23, 256  ;;  %p530_p3 = scmp.lt.s32.totalorder %s132_s23, %s132_s23 }
  0x10   : > { %p436_p9 = pneg %p731_p8  ;;  %p523_p12 = scmp.ne.s32.totalorder %s132_s23, %s522_s26 }
  0x11   : > { %p531_p5 = scmp.lt.s32.totalorder %s522_s26, %s522_s26 }
  0x12   : > { %p739_p10 = pnand %p436_p9, %p711_p1 }
  0x13   : > { %p532_p7 = por %p531_p5, %p530_p3 }
  0x14   : > { %p513_p11 = pneg %p739_p10 }
  0x16   : > { %p525_p13 = pnand %p523_p12, %p513_p11 }
  0x18   : > { %p526_p0 = pneg %p525_p13 }
  0x1a   : > { %p533_p6 = pnand %p532_p7, %p526_p0 }
  0x1c   : > { %536 = shalt.err (!%p533_p6)
}
  0x1d   : > { %s652_s27 = smov 128   ;;  %s653_s28 = smov 8  }
  0x1e   : > { %439 = dma.hbm_to_vmem [thread:$0]  (!%p739_p10), %s857_s0, 256, %s132_s23, [#allocation3], %s652_s27, %s652_s27, %s653_s28  }
  0x1f   : > { %p29_p9 = scmp.ge.s32.totalorder %s28_s25, 3  ;;  %s64_s3 = sadd.s32 1, %s637_s11 }
  0x20   : > { %p71_p6 = scmp.ne.s32.totalorder %s637_s11, %s633_s10  ;;  %p72_p11 = scmp.eq.s32.totalorder %s649_s14, 0 }
  0x21   : > { %s878_s25 = smov (%p29_p9, %s28_s25), 0  ;;  %p449_p0 = scmp.lt.s32.totalorder %s649_s14, 3 }
  0x22   : > { %p757_p12 = por %p72_p11, %p71_p6  ;;  %p763_p13 = por %p715_p2, %p71_p6 }
  0x23   : > { %s61_s6 = ssub.s32 %s645_s13, %s878_s25  ;;  %s145_s7 = sand.u32 1, %s637_s11  }
  0x24   : > { %s868_s5 = scalar_select %p763_p13, 1, 0 }
  0x25   : > { %p62_p10 = scmp.eq.s32.totalorder %s61_s6, 0  ;;  %s396_s8 = sshll.u32 %s145_s7, 4 }
  0x26   : > { %s413_s16 = sshll.u32 %s645_s13, 8  ;;  %s149_s26 = scalar_lea.vmem [#allocation5], %s396_s8 }
  0x27   : > { %s772_s15 = scalar_select %p62_p10, %s637_s11, %s64_s3  }
  0x28   : > { %s155_s24 = scalar_lea.hbm %s858_s1, %s413_s16  ;;  %s156_s27 = sshll.u32 %s149_s26, 4  ;;  %s157_s27 = int_to_ptr.vmem [resolvable:$true] %s156_s27 }
  0x29   : > { %p780_p2 = pnand %p449_p0, %p757_p12  ;;  %s146_s28 = scalar_lea.sflag [#allocation6], %s145_s7 }
  0x2a   : > { %s550_s29 = scalar_lea.vmem %s157_s27, 256  ;;  %s654_s30 = smov [#allocation5]  }
  0x2b   : > { %p539_p3 = pneg %p780_p2  ;;  %p551_p5 = scmp.ne.s32.totalorder %s157_s27, %s550_s29 }
  0x2c   : > { %s555_s3 = sshll.u32 %s654_s30, 4  ;;  %s556_s3 = int_to_ptr.vmem [resolvable:$false] %s555_s3 }
  0x2d   : > { %p553_p7 = pnand %p551_p5, %p539_p3  ;;  %s557_s6 = scalar_lea.vmem %s556_s3, 512 }
  0x2e   : > { %p558_p6 = scmp.lt.s32.totalorder %s157_s27, %s556_s3  ;;  %p559_p11 = scmp.lt.s32.totalorder %s557_s6, %s550_s29 }
  0x2f   : > { %p554_p9 = pneg %p553_p7 }
  0x30   : > { %p560_p10 = por %p559_p11, %p558_p6 }
  0x32   : > { %p561_p13 = pnand %p560_p10, %p554_p9 }
  0x34   : > { %564 = shalt.err (!%p561_p13)
}
  0x35   : > { %s655_s4 = smov 64   ;;  %s656_s8 = smov 4  }
  0x36   : > { %443 = dma.hbm_to_vmem [thread:$0]  (!%p780_p2), %s155_s24, 256, %s157_s27, %s146_s28, %s655_s4, %s655_s4, %s656_s8  }
  0x37   : > { %168 = sbr.rel (%p731_p8) target bundleno = 287 (0x11f), region = 28 }
  0x3c   : > { %616 = dma.done.wait (%p711_p1), [#allocation3], 256  }
  0x3d   : > { %618 = vsyncadd (%p711_p1), [#allocation3], 4294967040  ;;  %s795_s7 = sand.u32 1, %s633_s10  }
  0x3e   : > { %s401_s16 = sshll.u32 %s795_s7, 4  ;;  %s175_s22 = scalar_lea.sflag [#allocation6], %s795_s7 }
  0x3f   : > { %s178_s23 = scalar_lea.vmem [#allocation5], %s401_s16 }
  0x40   : > { %620 = dma.done.wait (%p721_p4), %s175_s22, 256  }
  0x41   : > { %622 = vsyncadd (%p721_p4), %s175_s22, 4294967040  ;;  %v657_v0 = vmov 0.0   ;;  %vm658_vm0 = vmmov 0   ;;  %v509_v1 = vld [vmem:[%s178_s23 + $0x8] sm:$0xff]   ;;  %v510_v2 = vld [vmem:[%s178_s23] sm:$0xff]   ;;  %vm221_vm1 = vcmask 261120  }
  0x42   : > { %420 = vmatprep.subr.bf16.mxu0 %v657_v0  ;;  %424 = vmatprep.mubr.msk.bf16.mxu0 %vm658_vm0, %v657_v0  ;;  %v202_v3 = vld [vmem:[#allocation2] sm:$0xff]  ;;  %v203_v4 = vld [vmem:[#allocation2 + $0x8] sm:$0xff]  ;;  %s402_s17 = sshll.u32 %s795_s7, 3  ;;  %vm274_vm2 = vcmask 257024   ;;  %s416_s24 = sshll.u32 %s641_s12, 7 }
  0x43   : > { %421 = vmatpush3.bf16.msra.mxu0 %v509_v1  ;;  %v204_v5 = vpack.c.bf16 %v203_v4, %v202_v3  ;;  %s198_s19 = scalar_lea.vmem [#allocation7], %s402_s17  ;;  %s810_s18 = scalar_lea.hbm %s859_s2, %s416_s24 }
  0x44   : > { %422 = vmatprep.subr.bf16.mxu0 %v657_v0  ;;  %s293_s21 = sshll.u32 %s198_s19, 4  ;;  %s278_s28 = scalar_lea.sflag [#allocation4], %s795_s7  ;;  %s805_s21 = int_to_ptr.vmem [resolvable:$true] %s293_s21 }
  0x45   : > { %s565_s29 = scalar_lea.vmem %s805_s21, 128  ;;  %p870_p4 = scmp.ne.s32.totalorder %s868_s5, 0 }
  0x46   : > { %p566_p1 = scmp.ne.s32.totalorder %s805_s21, %s565_s29  ;;  %s659_s12 = smov [#allocation7]  }
  0x47   : > { %423 = vmatpush3.bf16.msra.mxu0 %v510_v2  ;;  %s569_s30 = sshll.u32 %s659_s12, 4  ;;  %s570_s30 = int_to_ptr.vmem [resolvable:$false] %s569_s30 }
  0x48   : > { %p567_p8 = pnand %p566_p1, %p870_p4  ;;  %s571_s3 = scalar_lea.vmem %s570_s30, 256 }
  0x49   : > { %p572_p13 = scmp.lt.s32.totalorder %s805_s21, %s570_s30  ;;  %p573_p0 = scmp.lt.s32.totalorder %s571_s3, %s565_s29 }
  0x4a   : > { %425 = vmatmul.mubr.msk.bf16.vlgmr.msra.gmra.mxu0 %vm221_vm1, %v204_v5  ;;  %p568_p12 = pneg %p567_p8 }
  0x4b   : > { %p574_p2 = por %p573_p0, %p572_p13 }
  0x4d   : > { %p575_p3 = pnand %p574_p2, %p568_p12 }
 0x10a   : > { %v259_v6 = vpop.f32.mrf.mxu0 }
 0x10b   : > { %v414_v7 = vpack.c.bf16 %v259_v6, %v259_v6 }
 0x10c   : > { %v426_v8 = vpop.f32.mrf.mxu0 }
 0x10d   : > { %275 = vst.msk [vmem:[%s198_s19] sm:$0xf] %vm274_vm2, %v414_v7 }
 0x10e   : > { %v262_v9 = vpop.f32.mrf.mxu0 }
 0x10f   : > { %v415_v10 = vpack.c.bf16 %v262_v9, %v262_v9 }
 0x110   : > { %v427_v11 = vpop.f32.mrf.mxu0 }
 0x111   : > { %276 = vst.msk [vmem:[%s198_s19 + $0x4] sm:$0xf] %vm274_vm2, %v415_v10 }
 0x112   : > { %578 = shalt.err (!%p575_p3)
}
 0x113   : > { %s579_s6 = scalar_lea.hbm %s810_s18, 128  ;;  %s583_s16 = scalar_lea.hbm %s859_s2, 384 }
 0x114   : > { %p580_p5 = scmp.ne.s32.totalorder %s810_s18, %s579_s6  ;;  %p584_p6 = scmp.lt.s32.totalorder %s810_s18, %s859_s2 }
 0x115   : > { %p585_p11 = scmp.lt.s32.totalorder %s583_s16, %s579_s6 }
 0x116   : > { %p581_p7 = pnand %p580_p5, %p870_p4 }
 0x117   : > { %p586_p10 = por %p585_p11, %p584_p6 }
 0x118   : > { %p582_p9 = pneg %p581_p7 }
 0x11a   : > { %p587_p1 = pnand %p586_p10, %p582_p9 }
 0x11c   : > { %590 = shalt.err (!%p587_p1)
}
 0x11d   : > { %s660_s17 = smov 64   ;;  %s661_s19 = smov 4  }
 0x11e   : > { %434 = dma.vmem_to_hbm [thread:$0]  (%p870_p4), %s805_s21, 128, %s810_s18, %s278_s28, %s660_s17, %s660_s17, %s661_s19  }
 0x11f PF: > { %p451_p8 = scmp.ge.s32.totalorder %s649_s14, 2  ;;  %s308_s24 = sand.u32 1, %s629_s9  }
 0x120   : > { %p871_p12 = scmp.ne.s32.totalorder %s864_s20, 0  ;;  %s309_s26 = scalar_lea.sflag [#allocation4], %s308_s24 }
 0x122   : > { %p445_p13 = pnand %p451_p8, %p871_p12 }
 0x124   : > { %p446_p0 = pneg %p445_p13 }
 0x126   : > { %624 = dma.done.wait (%p446_p0), %s309_s26, 128  }
 0x127   : > { %626 = vsyncadd (%p446_p0), %s309_s26, 4294967168  ;;  %s19_s14 = sadd.s32 1, %s649_s14   ;;  %s872_s9 = smov %s633_s10 }
 0x128   : > { %p16_p2 = scmp.ge.s32.totalorder %s19_s14, 5   ;;  %s873_s10 = smov %s637_s11 }
 0x129   : > { %s874_s11 = smov %s772_s15  ;;  %s875_s12 = smov %s645_s13 }
 0x12a   : > { %s876_s13 = smov %s878_s25  ;;  %18 = sbr.rel (!%p16_p2) target bundleno = 7 (0x7), region = 79 }
 0x12f   :  { %314 = vsyncpa [#allocation3], 1 }
 0x130   :  { %316 = vsyncpa [#allocation3 + $0x1], 1 }
 0x131   :  { %317 = vsyncpa [#allocation6], 1 }
 0x132   :  { %319 = vsyncpa [#allocation6 + $0x1], 1 }
 0x133   :  { %320 = vsyncpa [#allocation4], 1 }
 0x134   :  { %322 = vsyncpa [#allocation4 + $0x1], 1 }

</bundles_post_ra>
